<compile_context>
chip_gen: v7x
topology: tpu7x:2x2x1
jax: 0.10.0
libtpu: 0.0.40
codegen_flags: <defaults>
</compile_context>

<pallas_src>
import jax
import jax.numpy as jnp
from jax.experimental import pallas as pl
from jax.experimental.pallas import tpu as pltpu


def _mlp_kernel(x_ref, w1_ref, b1_ref, w2_ref, b2_ref, o_ref):
    # x_ref:  [TB, D_in]  VMEM (per-tile, pipelined)
    # w1_ref: [D_in, H]   VMEM (resident)
    # b1_ref: [1, H]      VMEM (resident)
    # w2_ref: [1, H]      VMEM (resident)
    # b2_ref: [1, 1]      SMEM (scalar)
    # o_ref:  [1, TB]     VMEM (lane-dense output tile)

    # fc1 + relu (MXU matmul, f32 accumulation; no explicit up-cast of x)
    h = jnp.dot(x_ref[...], w1_ref[...], preferred_element_type=jnp.float32)
    h = jnp.maximum(h + b1_ref[...].astype(jnp.float32), 0.0)          # [TB, H]

    # fc2 as an MXU matmul producing a lane-dense [1, TB] row:
    #   [1, H] x [TB, H]^T  (contract the H axes)
    logit = jax.lax.dot_general(
        w2_ref[...].astype(jnp.float32), h,
        dimension_numbers=(((1,), (1,)), ((), ())),
        preferred_element_type=jnp.float32,
    ) + b2_ref[0, 0]                                                   # [1, TB]

    o_ref[...] = jax.nn.sigmoid(logit).astype(o_ref.dtype)


def semantic_entropy_prob_spec(x, w1, b1, w2, b2, *, tb=512):
    """x: [B, D_in]; w1: [D_in, H]; b1: [H]; w2: [H]; b2: scalar -> [B]."""
    B, D_in = x.shape
    H = w1.shape[1]

    def _round_up(a, m):
        return (a + m - 1) // m * m

    # Tile size: single tile for small B (padded to the 8-sublane boundary),
    # otherwise a 128-multiple tile so DMA blocks / output lanes stay aligned.
    if B <= tb:
        TB = max(8, _round_up(B, 8))
    else:
        TB = tb
    B_pad = _round_up(B, TB)
    num_tiles = B_pad // TB

    if B_pad != B:
        x = jnp.pad(x, ((0, B_pad - B), (0, 0)))

    b1_2d = b1.reshape(1, H)
    w2_2d = w2.reshape(1, H)
    b2_2d = jnp.asarray(b2, jnp.float32).reshape(1, 1)

    out = pl.pallas_call(
        _mlp_kernel,
        out_shape=jax.ShapeDtypeStruct((1, B_pad), jnp.float32),
        grid_spec=pltpu.PrefetchScalarGridSpec(
            num_scalar_prefetch=0,
            grid=(num_tiles,),
            in_specs=[
                pl.BlockSpec((TB, D_in), lambda i: (i, 0)),      # x: streamed
                pl.BlockSpec((D_in, H), lambda i: (0, 0)),       # w1: resident
                pl.BlockSpec((1, H), lambda i: (0, 0)),          # b1: resident
                pl.BlockSpec((1, H), lambda i: (0, 0)),          # w2: resident
                pl.BlockSpec(memory_space=pltpu.MemorySpace.SMEM),  # b2 scalar
            ],
            out_specs=pl.BlockSpec((1, TB), lambda i: (0, i)),   # lane-dense
        ),
        compiler_params=pltpu.CompilerParams(
            dimension_semantics=("parallel",),
        ),
    )(x, w1, b1_2d, w2_2d, b2_2d)

    return out[0, :B]  # undo layout + squeeze(-1)


def _reference(x, w1, b1, w2, b2):
    h = jnp.maximum(x @ w1 + b1, 0.0)
    return jax.nn.sigmoid(h @ w2 + b2)


if __name__ == "__main__":
    key = jax.random.PRNGKey(0)
    input_dim, hidden_dim = 32, 32

    kx, k1, k2, k3, k4, kx2 = jax.random.split(key, 6)

    # Deterministic "PyTorch-like" uniform init for the Linear layers.
    bound1 = 1.0 / jnp.sqrt(input_dim)
    w1 = jax.random.uniform(k1, (input_dim, hidden_dim), jnp.float32, -bound1, bound1)
    b1 = jax.random.uniform(k2, (hidden_dim,), jnp.float32, -bound1, bound1)
    bound2 = 1.0 / jnp.sqrt(hidden_dim)
    w2 = jax.random.uniform(k3, (hidden_dim,), jnp.float32, -bound2, bound2)
    b2 = jax.random.uniform(k4, (), jnp.float32, -bound2, bound2)

    # Case 1: small batch, single-tile path.
    B = 8
    x = jax.random.normal(kx, (B, input_dim), dtype=jnp.float32)
    out = jax.block_until_ready(semantic_entropy_prob_spec(x, w1, b1, w2, b2))
    ref = _reference(x, w1, b1, w2, b2)
    assert out.shape == (B,), out.shape
    assert jnp.allclose(out, ref, atol=1e-5, rtol=1e-5), (out, ref)

    # Case 2: multi-tile grid + padding (B not a multiple of the tile).
    B2 = 300
    x2 = jax.random.normal(kx2, (B2, input_dim), dtype=jnp.float32)
    out2 = jax.block_until_ready(
        semantic_entropy_prob_spec(x2, w1, b1, w2, b2, tb=128)
    )
    ref2 = _reference(x2, w1, b1, w2, b2)
    assert out2.shape == (B2,), out2.shape
    assert jnp.allclose(out2, ref2, atol=1e-5, rtol=1e-5), (out2, ref2)

    print("KERNEL_OK")
</pallas_src>

<mosaic_0001>
module attributes {stable_mosaic.version = 11 : i64} {
  func.func @_mlp_kernel(%arg0: i32, %arg1: memref<8x32xf32, #tpu.memory_space<vmem>>, %arg2: memref<32x32xf32, #tpu.memory_space<vmem>>, %arg3: memref<1x32xf32, #tpu.memory_space<vmem>>, %arg4: memref<1x32xf32, #tpu.memory_space<vmem>>, %arg5: memref<1x1xf32, #tpu.memory_space<smem>>, %arg6: memref<1x8xf32, #tpu.memory_space<vmem>>) attributes {dimension_semantics = [#tpu.dimension_semantics<parallel>], iteration_bounds = array<i64: 1>, scalar_prefetch = 0 : i64, scratch_operands = 0 : i64, tpu.core_type = #tpu.core_type<tc>, window_params = [{transform_indices = @transform_0, window_bounds = array<i64: 8, 32>}, {pipeline_mode = #tpu.pipeline_mode<synchronous>, transform_indices = @transform_1, window_bounds = array<i64: 32, 32>}, {pipeline_mode = #tpu.pipeline_mode<synchronous>, transform_indices = @transform_2, window_bounds = array<i64: 1, 32>}, {pipeline_mode = #tpu.pipeline_mode<synchronous>, transform_indices = @transform_3, window_bounds = array<i64: 1, 32>}, {transform_indices = @transform_4, window_bounds = array<i64: 1, 1>}, {transform_indices = @transform_5, window_bounds = array<i64: 1, 8>}]} {
    %c0 = arith.constant 0 : index
    %c0_0 = arith.constant 0 : index
    %0 = vector.load %arg1[%c0, %c0_0] : memref<8x32xf32, #tpu.memory_space<vmem>>, vector<8x32xf32>
    %c0_1 = arith.constant 0 : index
    %c0_2 = arith.constant 0 : index
    %1 = vector.load %arg2[%c0_1, %c0_2] : memref<32x32xf32, #tpu.memory_space<vmem>>, vector<32x32xf32>
    %cst = arith.constant dense<0.000000e+00> : vector<8x32xf32>
    %2 = tpu.matmul %0, %1, %cst {dimension_numbers = #tpu.dot_dimension_numbers<[1], [0], [0], [1], [0, 0, 1, 1], [], []>} : vector<8x32xf32>, vector<32x32xf32>, vector<8x32xf32> -> vector<8x32xf32>
    %c0_3 = arith.constant 0 : index
    %c0_4 = arith.constant 0 : index
    %3 = vector.load %arg3[%c0_3, %c0_4] : memref<1x32xf32, #tpu.memory_space<vmem>>, vector<1x32xf32>
    %4 = vector.broadcast %3 : vector<1x32xf32> to vector<8x32xf32>
    %5 = arith.addf %2, %4 : vector<8x32xf32>
    %cst_5 = arith.constant 0.000000e+00 : f32
    %6 = vector.broadcast %cst_5 : f32 to vector<8x32xf32>
    %7 = arith.maximumf %5, %6 : vector<8x32xf32>
    %c0_6 = arith.constant 0 : index
    %c0_7 = arith.constant 0 : index
    %8 = vector.load %arg4[%c0_6, %c0_7] : memref<1x32xf32, #tpu.memory_space<vmem>>, vector<1x32xf32>
    %cst_8 = arith.constant dense<0.000000e+00> : vector<1x8xf32>
    %9 = tpu.matmul %8, %7, %cst_8 {dimension_numbers = #tpu.dot_dimension_numbers<[1], [1], [0], [0], [0, 0, 1, 0], [], []>} : vector<1x32xf32>, vector<8x32xf32>, vector<1x8xf32> -> vector<1x8xf32>
    %c0_9 = arith.constant 0 : index
    %c0_10 = arith.constant 0 : index
    %10 = memref.load %arg5[%c0_9, %c0_10] : memref<1x1xf32, #tpu.memory_space<smem>>
    %11 = vector.broadcast %10 : f32 to vector<1x8xf32>
    %12 = arith.addf %9, %11 : vector<1x8xf32>
    %13 = arith.negf %12 : vector<1x8xf32>
    %14 = math.exp %13 : vector<1x8xf32>
    %cst_11 = arith.constant 1.000000e+00 : f32
    %15 = vector.broadcast %cst_11 : f32 to vector<1x8xf32>
    %16 = arith.addf %15, %14 : vector<1x8xf32>
    %17 = arith.divf %15, %16 : vector<1x8xf32>
    %c0_12 = arith.constant 0 : index
    %c0_13 = arith.constant 0 : index
    %18 = vector.load %arg6[%c0_12, %c0_13] : memref<1x8xf32, #tpu.memory_space<vmem>>, vector<1x8xf32>
    tpu.vector_store %arg6[%c0_12, %c0_13], %17 {strides = array<i32>} : memref<1x8xf32, #tpu.memory_space<vmem>>, vector<1x8xf32>,
    return
  }
  func.func @transform_0(%arg0: i32) -> (i32, i32) {
    %c0_i32 = arith.constant 0 : i32
    %c0_i32_0 = arith.constant 0 : i32
    return %arg0, %c0_i32 : i32, i32
  }
  func.func @transform_1(%arg0: i32) -> (i32, i32) {
    %c0_i32 = arith.constant 0 : i32
    %c0_i32_0 = arith.constant 0 : i32
    %c0_i32_1 = arith.constant 0 : i32
    return %c0_i32, %c0_i32_0 : i32, i32
  }
  func.func @transform_2(%arg0: i32) -> (i32, i32) {
    %c0_i32 = arith.constant 0 : i32
    %c0_i32_0 = arith.constant 0 : i32
    %c0_i32_1 = arith.constant 0 : i32
    return %c0_i32, %c0_i32_0 : i32, i32
  }
  func.func @transform_3(%arg0: i32) -> (i32, i32) {
    %c0_i32 = arith.constant 0 : i32
    %c0_i32_0 = arith.constant 0 : i32
    %c0_i32_1 = arith.constant 0 : i32
    return %c0_i32, %c0_i32_0 : i32, i32
  }
  func.func @transform_4(%arg0: i32) -> (i32, i32) {
    %c0_i32 = arith.constant 0 : i32
    %c0_i32_0 = arith.constant 0 : i32
    %c0_i32_1 = arith.constant 0 : i32
    return %c0_i32, %c0_i32_0 : i32, i32
  }
  func.func @transform_5(%arg0: i32) -> (i32, i32) {
    %c0_i32 = arith.constant 0 : i32
    %c0_i32_0 = arith.constant 0 : i32
    return %c0_i32, %arg0 : i32, i32
  }
}

</mosaic_0001>

<bundles_post_ra>
// kernel: tpu_custom_call.1
= control target key start
LH: loop header
LB: loop body
LE: loop exit
PB: predicated region body
PF: predicated region fallthrough
CT: control target
= control target key end

     0   :  { %11 = vsyncpa [#allocation4], 0  ;;  %s446_s0 = inlined_call_operand.hbm [shape: f32[8,32], index: 0, kind: input, shape index: {}]   ;;  %s447_s1 = inlined_call_operand.hbm [shape: f32[32,32], index: 1, kind: input, shape index: {}]   ;;  %s448_s2 = inlined_call_operand.vmem [shape: f32[1,32], index: 2, kind: input, shape index: {}]   ;;  %s449_s3 = inlined_call_operand.vmem [shape: f32[1,32], index: 3, kind: input, shape index: {}]   ;;  %s450_s4 = inlined_call_operand.<no memory space> [shape: f32[1,1], index: 4, kind: input, shape index: {}]   ;;  %s451_s5 = inlined_call_operand.hbm [shape: f32[1,8], index: 5, kind: output, shape index: {}]  }
   0x1   :  { %12 = vsyncpa [#allocation7], 0 }
   0x2   :  { %13 = vsyncpa [#allocation5], 0  ;;  %s356_s18 = smov [#allocation3]   ;;  %s357_s20 = smov [#allocation6]  }
   0x3   :  { %s20_s19 = sshll.u32 %s356_s18, 4  ;;  %s29_s21 = sshll.u32 %s357_s20, 4  ;;  %s21_s19 = int_to_ptr.vmem [resolvable:$true] %s20_s19  ;;  %s394_s21 = int_to_ptr.vmem [resolvable:$true] %s29_s21 }
   0x4   :  { %s284_s24 = scalar_lea.hbm %s446_s0, 128 }
   0x5   :  { %p285_p0 = scmp.ne.s32.totalorder %s446_s0, %s284_s24  ;;  %p288_p1 = scmp.lt.u32.totalorder %s284_s24, %s446_s0 }
   0x7   :  { %p290_p2 = pnand %p288_p1, %p285_p0 }
   0x9   :  { %293 = shalt.err (!%p290_p2)
}
   0xa   :  { %s294_s29 = scalar_lea.vmem %s21_s19, 128  ;;  %p299_p4 = scmp.lt.s32.totalorder %s21_s19, %s21_s19 }
   0xb   :  { %p295_p3 = scmp.ne.s32.totalorder %s21_s19, %s294_s29  ;;  %p300_p5 = scmp.lt.s32.totalorder %s294_s29, %s294_s29 }
   0xd   :  { %p301_p6 = por %p300_p5, %p299_p4 }
   0xf   :  { %p302_p7 = pnand %p301_p6, %p295_p3 }
  0x11   :  { %305 = shalt.err (!%p302_p7)
}
  0x12   :  { %23 = dma.hbm_to_vmem [thread:$0]  %s446_s0, 128, %s21_s19, [#allocation4]  }
  0x13   :  { %s306_s9 = scalar_lea.hbm %s447_s1, 512 }
  0x14   :  { %p307_p8 = scmp.ne.s32.totalorder %s447_s1, %s306_s9  ;;  %p310_p9 = scmp.lt.u32.totalorder %s306_s9, %s447_s1 }
  0x16   :  { %p312_p10 = pnand %p310_p9, %p307_p8 }
  0x18   :  { %315 = shalt.err (!%p312_p10)
}
  0x19   :  { %s316_s14 = scalar_lea.vmem %s394_s21, 512  ;;  %p321_p12 = scmp.lt.s32.totalorder %s394_s21, %s394_s21 }
  0x1a   :  { %p317_p11 = scmp.ne.s32.totalorder %s394_s21, %s316_s14  ;;  %p322_p13 = scmp.lt.s32.totalorder %s316_s14, %s316_s14 }
  0x1c   :  { %p323_p0 = por %p322_p13, %p321_p12 }
  0x1e   :  { %p324_p1 = pnand %p323_p0, %p317_p11 }
  0x20   :  { %327 = shalt.err (!%p324_p1)
}
  0x21   :  { %s358_s0 = smov 128   ;;  %s359_s15 = smov 8  }
  0x22   :  { %35 = dma.hbm_to_vmem [thread:$0]  %s447_s1, 512, %s394_s21, [#allocation7], %s358_s0, %s358_s0, %s359_s15  }
  0x23   :  { %350 = dma.done.wait [#allocation4], 128  }
  0x24   :  { %351 = vsyncadd [#allocation4], 4294967168 }
  0x25   :  { %352 = dma.done.wait [#allocation7], 512  }
  0x26   :  { %353 = vsyncadd [#allocation7], 4294966784  ;;  %v360_v0 = vmov 0.0|0.0   ;;  %vm361_vm0 = vmmov 0   ;;  %v362_v1 = vmov 0.0   ;;  %v49_v2 = vld [vmem:[#allocation6] sm:$0xff]  ;;  %v137_v15 = vstv %s450_s4 }
  0x27   :  { %266 = vmatprep.subr.bf16.mxu0 %v360_v0  ;;  %258 = vmatprep.mubr.msk.f32.mxu0 %vm361_vm0, %v362_v1  ;;  %v50_v3 = vld [vmem:[#allocation6 + $0x8] sm:$0xff]  ;;  %v51_v4 = vld [vmem:[#allocation6 + $0x10] sm:$0xff]  ;;  %v52_v6 = vld [vmem:[#allocation6 + $0x18] sm:$0xff]  ;;  %vm60_vm1 = vcmask 261120   ;;  %vm220_vm2 = vcmask 57344  }
  0x28   :  { %261 = vmatprep.subr.mxu1 %v362_v1  ;;  %263 = vmatprep.mubr.msk.f32.mxu1 %vm361_vm0, %v362_v1  ;;  %v267_v5 = vpack.c.bf16 %v50_v3, %v49_v2  ;;  %v270_v7 = vpack.c.bf16 %v52_v6, %v51_v4  ;;  %v48_v8 = vld [vmem:[#allocation3] sm:$0xff] }
  0x29   :  { %v238_v9 = vld [vmem:[%s448_s2] ss:$0 sm:$0xff]  ;;  %s363_s2 = smov [#allocation8]  }
  0x2a   :  { %268 = vmatpush3.bf16.msra.mxu0 %v267_v5  ;;  %v135_v14 = vld [vmem:[%s449_s3] sm:$0x1]  ;;  %s228_s23 = sshll.u32 %s363_s2, 4  ;;  %s229_s23 = int_to_ptr.vmem [resolvable:$true] %s228_s23 }
  0x2b   :  { %269 = vmatprep.subr.bf16.mxu0 %v360_v0  ;;  %s328_s3 = scalar_lea.vmem %s229_s23, 16  ;;  %s332_s24 = scalar_lea.vmem %s229_s23, 32 }
  0x2c   :  { %p329_p2 = scmp.ne.s32.totalorder %s229_s23, %s328_s3  ;;  %p333_p3 = scmp.lt.s32.totalorder %s229_s23, %s229_s23 }
  0x2d   :  { %p334_p4 = scmp.lt.s32.totalorder %s332_s24, %s328_s3 }
  0x2e   :  { %271 = vmatpush3.bf16.msra.mxu0 %v270_v7 }
  0x2f   :  { %p335_p5 = por %p334_p4, %p333_p3 }
  0x31   :  { %259 = vmatmul.mubr.msk.f32.vlgmr.msra.gmra.mrb[0].mxu0 %vm60_vm1, %v48_v8  ;;  %p336_p6 = pnand %p335_p5, %p329_p2 }
 0x104   :  { %v130_v10 = vpop.f32.mrb[0].mxu0 }
 0x105   :  { %v131_v11 = vadd.f32 %v238_v9, %v130_v10  ;;  %v260_v12 = vpop.f32.mrb[1].mxu0 }
 0x107   :  { %v134_v13 = vmax.f32 %v131_v11, 0.0 }
 0x109   :  { %262 = vmatpush3.xpose.msk.msra.mxu1 %vm60_vm1, %v134_v13 }
 0x10c   :  { %264 = vmatmul.mubr.msk.f32.vlgmr.msra.gmra.mrb[0].mxu1 %vm60_vm1, %v135_v14 }
 0x1df   :  { %v210_v16 = vpop.f32.mrb[0].mxu1 }
 0x1e0   :  { %v211_v17 = vadd.f32 %v210_v16, %v137_v15  ;;  %v265_v18 = vpop.f32.mrb[1].mxu1 }
 0x1e2   :  { %v242_v19 = vmul.f32 -1.442695, %v211_v17 }
 0x1e4   :  { %280 = vpow2.f32 %v242_v19 }
 0x1ee   :  { %v281_v20 = vpop.eup %280 }
 0x1ef   :  { %v217_v21 = vadd.f32 1.0, %v281_v20 }
 0x1f1   :  { %282 = vrcp.f32 %v217_v21 }
 0x1fb   :  { %v283_v22 = vpop.eup %282 }
 0x1fc   :  { %221 = vst.msk [vmem:[#allocation8] sm:$0x1] %vm220_vm2, %v283_v22 }
 0x1fd   :  { %339 = shalt.err (!%p336_p6)
}
 0x1fe   :  { %s340_s26 = scalar_lea.hbm %s451_s5, 16 }
 0x1ff   :  { %p341_p7 = scmp.ne.s32.totalorder %s451_s5, %s340_s26  ;;  %p344_p8 = scmp.lt.u32.totalorder %s340_s26, %s451_s5 }
 0x201   :  { %p346_p9 = pnand %p344_p8, %p341_p7 }
 0x203   :  { %349 = shalt.err (!%p346_p9)
}
 0x204   :  { %231 = dma.vmem_to_hbm [thread:$0]  %s229_s23, 16, %s451_s5, [#allocation5]  }
 0x205   :  { %354 = dma.done.wait [#allocation5], 16  }
 0x206   :  { %355 = vsyncadd [#allocation5], 4294967280 }
 0x207   :  { %235 = vsyncpa [#allocation4], 1 }
 0x208   :  { %236 = vsyncpa [#allocation7], 1 }
 0x209   :  { %237 = vsyncpa [#allocation5], 1 }

</bundles_post_ra>
